<compile_context>
chip_gen: v6e
topology: v6e:2x2x1
jax: 0.10.0
libtpu: 0.0.40
codegen_flags: <defaults>
</compile_context>

<pallas_src>
import jax
import jax.numpy as jnp
from jax.experimental import pallas as pl
from jax.experimental.pallas import tpu as pltpu


# ---------------------------------------------------------------------------
# Pallas kernel: per-chunk fused forward (chunk = BC images)
#   conv-as-matmul -> +bias -> ReLU -> pool-as-matmul -> head matmul -> classifier matmul
# ---------------------------------------------------------------------------
def model_kernel(p_ref, pool_ref, wc_ref, bc_ref, wh_ref, bh_ref, wl_ref, bl_ref,
                 dist_ref, logit_ref):
    patches = p_ref[0]                                              # (BC*P, K2Cp)  bf16
    # Stem conv (im2col matmul, bf16 in / f32 acc) + bias + ReLU    -> (BC*P, Cmid) f32
    conv = jnp.dot(patches, wc_ref[...], preferred_element_type=jnp.float32)
    conv = jnp.maximum(conv + bc_ref[...], 0.0)
    # Global average pool as block-diagonal matmul                  -> (BC, Cmid) f32
    pooled = jnp.dot(pool_ref[...], conv, preferred_element_type=jnp.float32)
    # Head: CNN features -> embedding (dirac distribution params)   -> (BC, D) f32
    emb = jnp.dot(pooled.astype(wh_ref.dtype), wh_ref[...],
                  preferred_element_type=jnp.float32) + bh_ref[...]
    dist_ref[0] = emb
    # Linear classifier: embedding -> logits                        -> (BC, C) f32
    logits = jnp.dot(emb.astype(wl_ref.dtype), wl_ref[...],
                     preferred_element_type=jnp.float32) + bl_ref[...]
    logit_ref[0] = logits


def model_forward(images_nchw, params):
    """Run the Model forward pass. images_nchw: (B, 3, S, S) float32 (PyTorch layout)."""
    wc, bc, wh, bh, wl, bl = (params[k] for k in
                              ("conv_w", "conv_b", "head_w", "head_b", "cls_w", "cls_b"))
    B, Cin, S, _ = images_nchw.shape
    KH, KW, _, Cmid = wc.shape
    D = wh.shape[1]
    C = wl.shape[1]
    Ho, Wo = S - KH + 1, S - KW + 1
    P = Ho * Wo
    K2C = KH * KW * Cin
    K2Cp = ((K2C + 31) // 32) * 32            # zero-pad contraction dim (27 -> 32)

    # Chunking: 2-way "parallel" grid axis feeds both TensorCores on v7x; no-op cost on v5e/v6e.
    NB = 2 if (B % 2 == 0 and B >= 2) else 1
    BC = B // NB
    BCP = BC * P

    # ---- Glue (pure data rearrangement, done once in the wrapper) ----
    # NCHW -> NHWC and im2col patch extraction; flatten batch into the matmul M dimension.
    x = jnp.transpose(images_nchw, (0, 2, 3, 1))                    # (B, S, S, Cin)
    patch_list = [x[:, kh:kh + Ho, kw:kw + Wo, :]
                  for kh in range(KH) for kw in range(KW)]          # each (B, Ho, Wo, Cin)
    patches = jnp.concatenate(patch_list, axis=-1)                  # (B, Ho, Wo, KH*KW*Cin)
    patches = patches.reshape(B, P, K2C)
    patches = jnp.pad(patches, ((0, 0), (0, 0), (0, K2Cp - K2C)))   # pad K to 32
    patches = patches.reshape(NB, BCP, K2Cp).astype(jnp.bfloat16)   # (NB, BC*P, K2Cp)

    # Conv weight: HWIO flattened (matches patch channel order), K-padded, bf16.
    wc_mat = jnp.pad(wc.reshape(K2C, Cmid), ((0, K2Cp - K2C), (0, 0))).astype(jnp.bfloat16)
    wh_b = wh.astype(jnp.bfloat16)
    wl_b = wl.astype(jnp.bfloat16)
    bc_row = bc.reshape(1, Cmid).astype(jnp.float32)
    bh_row = bh.reshape(1, D).astype(jnp.float32)
    bl_row = bl.reshape(1, C).astype(jnp.float32)

    # Block-diagonal pooling matrix: pooled[b] = mean over that image's P conv rows.
    pool_mat = ((jnp.arange(BCP) // P)[None, :] == jnp.arange(BC)[:, None]
                ).astype(jnp.float32) / float(P)                    # (BC, BC*P)

    dist3, logit3 = pl.pallas_call(
        model_kernel,
        out_shape=(jax.ShapeDtypeStruct((NB, BC, D), jnp.float32),
                   jax.ShapeDtypeStruct((NB, BC, C), jnp.float32)),
        grid_spec=pltpu.PrefetchScalarGridSpec(
            num_scalar_prefetch=0,
            grid=(NB,),
            in_specs=[
                pl.BlockSpec((1, BCP, K2Cp), lambda i: (i, 0, 0)),  # im2col patches (per chunk)
                pl.BlockSpec((BC, BCP),      lambda i: (0, 0)),     # pooling matrix
                pl.BlockSpec((K2Cp, Cmid),   lambda i: (0, 0)),     # conv weight
                pl.BlockSpec((1, Cmid),      lambda i: (0, 0)),     # conv bias
                pl.BlockSpec((Cmid, D),      lambda i: (0, 0)),     # head weight
                pl.BlockSpec((1, D),         lambda i: (0, 0)),     # head bias
                pl.BlockSpec((D, C),         lambda i: (0, 0)),     # classifier weight
                pl.BlockSpec((1, C),         lambda i: (0, 0)),     # classifier bias
            ],
            out_specs=[
                pl.BlockSpec((1, BC, D), lambda i: (i, 0, 0)),      # distributions slab
                pl.BlockSpec((1, BC, C), lambda i: (i, 0, 0)),      # logits slab
            ],
        ),
        compiler_params=pltpu.CompilerParams(
            dimension_semantics=("parallel",),
            vmem_limit_bytes=32 * 1024 * 1024),
    )(patches, pool_mat, wc_mat, bc_row, wh_b, bh_row, wl_b, bl_row)

    return {"distributions": dist3.reshape(B, 1, D),
            "logits": logit3.reshape(B, 1, C)}


# ---------------------------------------------------------------------------
# Pure-JAX reference (independent path through lax.conv, f32) for verification.
# ---------------------------------------------------------------------------
def reference_forward(images_nchw, params):
    wc, bc, wh, bh, wl, bl = (params[k] for k in
                              ("conv_w", "conv_b", "head_w", "head_b", "cls_w", "cls_b"))
    y = jax.lax.conv_general_dilated(
        images_nchw, wc, window_strides=(1, 1), padding="VALID",
        dimension_numbers=("NCHW", "HWIO", "NHWC"))                 # (B, Ho, Wo, Cmid)
    y = jnp.maximum(y + bc, 0.0)
    pooled = y.mean(axis=(1, 2))                                    # (B, Cmid)
    emb = pooled @ wh + bh                                          # (B, D)
    logits = emb @ wl + bl                                          # (B, num_classes)
    B = images_nchw.shape[0]
    return {"distributions": emb.reshape(B, 1, -1),
            "logits": logits.reshape(B, 1, -1)}


def init_params(key, *, cin=3, cmid=128, d=128, num_classes=10, kh=3, kw=3):
    ks = jax.random.split(key, 6)
    scale = 0.1
    return {
        "conv_w": scale * jax.random.normal(ks[0], (kh, kw, cin, cmid), jnp.float32),
        "conv_b": scale * jax.random.normal(ks[1], (cmid,), jnp.float32),
        "head_w": scale * jax.random.normal(ks[2], (cmid, d), jnp.float32),
        "head_b": scale * jax.random.normal(ks[3], (d,), jnp.float32),
        "cls_w":  scale * jax.random.normal(ks[4], (d, num_classes), jnp.float32),
        "cls_b":  scale * jax.random.normal(ks[5], (num_classes,), jnp.float32),
    }


if __name__ == "__main__":
    key = jax.random.PRNGKey(0)
    k_img, k_par = jax.random.split(key)

    B, Cin, S = 2, 3, 16
    D, NUM_CLASSES = 128, 10
    images = jax.random.normal(k_img, (B, Cin, S, S), jnp.float32)   # NCHW, like PyTorch
    params = init_params(k_par, cin=Cin, cmid=128, d=D, num_classes=NUM_CLASSES)

    out = model_forward(images, params)
    jax.block_until_ready(out)

    ref = reference_forward(images, params)
    assert out["distributions"].shape == (B, 1, D)
    assert out["logits"].shape == (B, 1, NUM_CLASSES)
    assert jnp.allclose(out["distributions"], ref["distributions"], rtol=2e-2, atol=2e-2)
    assert jnp.allclose(out["logits"], ref["logits"], rtol=2e-2, atol=2e-2)

    print("KERNEL_OK")
</pallas_src>

<mosaic_0001>
module attributes {stable_mosaic.version = 11 : i64} {
  func.func @model_kernel(%arg0: i32, %arg1: memref<1x196x32xbf16, #tpu.memory_space<vmem>>, %arg2: memref<1x196xf32, #tpu.memory_space<vmem>>, %arg3: memref<32x128xbf16, #tpu.memory_space<vmem>>, %arg4: memref<1x128xf32, #tpu.memory_space<vmem>>, %arg5: memref<128x128xbf16, #tpu.memory_space<vmem>>, %arg6: memref<1x128xf32, #tpu.memory_space<vmem>>, %arg7: memref<128x10xbf16, #tpu.memory_space<vmem>>, %arg8: memref<1x10xf32, #tpu.memory_space<vmem>>, %arg9: memref<1x1x128xf32, #tpu.memory_space<vmem>>, %arg10: memref<1x1x10xf32, #tpu.memory_space<vmem>>) attributes {dimension_semantics = [#tpu.dimension_semantics<parallel>], iteration_bounds = array<i64: 2>, scalar_prefetch = 0 : i64, scratch_operands = 0 : i64, tpu.core_type = #tpu.core_type<tc>, window_params = [{transform_indices = @transform_0, window_bounds = array<i64: 1, 196, 32>}, {pipeline_mode = #tpu.pipeline_mode<synchronous>, transform_indices = @transform_1, window_bounds = array<i64: 1, 196>}, {pipeline_mode = #tpu.pipeline_mode<synchronous>, transform_indices = @transform_2, window_bounds = array<i64: 32, 128>}, {pipeline_mode = #tpu.pipeline_mode<synchronous>, transform_indices = @transform_3, window_bounds = array<i64: 1, 128>}, {pipeline_mode = #tpu.pipeline_mode<synchronous>, transform_indices = @transform_4, window_bounds = array<i64: 128, 128>}, {pipeline_mode = #tpu.pipeline_mode<synchronous>, transform_indices = @transform_5, window_bounds = array<i64: 1, 128>}, {pipeline_mode = #tpu.pipeline_mode<synchronous>, transform_indices = @transform_6, window_bounds = array<i64: 128, 10>}, {pipeline_mode = #tpu.pipeline_mode<synchronous>, transform_indices = @transform_7, window_bounds = array<i64: 1, 10>}, {transform_indices = @transform_8, window_bounds = array<i64: 1, 1, 128>}, {transform_indices = @transform_9, window_bounds = array<i64: 1, 1, 10>}]} {
    %c0 = arith.constant 0 : index
    %c0_0 = arith.constant 0 : index
    %c0_1 = arith.constant 0 : index
    %0 = vector.load %arg1[%c0, %c0_0, %c0_1] : memref<1x196x32xbf16, #tpu.memory_space<vmem>>, vector<1x196x32xbf16>
    %1 = vector.shape_cast %0 : vector<1x196x32xbf16> to vector<196x32xbf16>
    %c0_2 = arith.constant 0 : index
    %c0_3 = arith.constant 0 : index
    %2 = vector.load %arg3[%c0_2, %c0_3] : memref<32x128xbf16, #tpu.memory_space<vmem>>, vector<32x128xbf16>
    %cst = arith.constant dense<0.000000e+00> : vector<196x128xf32>
    %3 = tpu.matmul %1, %2, %cst {dimension_numbers = #tpu.dot_dimension_numbers<[1], [0], [0], [1], [0, 0, 1, 1], [], []>} : vector<196x32xbf16>, vector<32x128xbf16>, vector<196x128xf32> -> vector<196x128xf32>
    %c0_4 = arith.constant 0 : index
    %c0_5 = arith.constant 0 : index
    %4 = vector.load %arg4[%c0_4, %c0_5] : memref<1x128xf32, #tpu.memory_space<vmem>>, vector<1x128xf32>
    %5 = vector.broadcast %4 : vector<1x128xf32> to vector<196x128xf32>
    %6 = arith.addf %3, %5 : vector<196x128xf32>
    %cst_6 = arith.constant 0.000000e+00 : f32
    %7 = vector.broadcast %cst_6 : f32 to vector<196x128xf32>
    %8 = arith.maximumf %6, %7 : vector<196x128xf32>
    %c0_7 = arith.constant 0 : index
    %c0_8 = arith.constant 0 : index
    %9 = vector.load %arg2[%c0_7, %c0_8] : memref<1x196xf32, #tpu.memory_space<vmem>>, vector<1x196xf32>
    %cst_9 = arith.constant dense<0.000000e+00> : vector<1x128xf32>
    %10 = tpu.matmul %9, %8, %cst_9 {dimension_numbers = #tpu.dot_dimension_numbers<[1], [0], [0], [1], [0, 0, 1, 1], [], []>} : vector<1x196xf32>, vector<196x128xf32>, vector<1x128xf32> -> vector<1x128xf32>
    %11 = arith.truncf %10 : vector<1x128xf32> to vector<1x128xbf16>
    %c0_10 = arith.constant 0 : index
    %c0_11 = arith.constant 0 : index
    %12 = vector.load %arg5[%c0_10, %c0_11] : memref<128x128xbf16, #tpu.memory_space<vmem>>, vector<128x128xbf16>
    %cst_12 = arith.constant dense<0.000000e+00> : vector<1x128xf32>
    %13 = tpu.matmul %11, %12, %cst_12 {dimension_numbers = #tpu.dot_dimension_numbers<[1], [0], [0], [1], [0, 0, 1, 1], [], []>} : vector<1x128xbf16>, vector<128x128xbf16>, vector<1x128xf32> -> vector<1x128xf32>
    %c0_13 = arith.constant 0 : index
    %c0_14 = arith.constant 0 : index
    %14 = vector.load %arg6[%c0_13, %c0_14] : memref<1x128xf32, #tpu.memory_space<vmem>>, vector<1x128xf32>
    %15 = arith.addf %13, %14 : vector<1x128xf32>
    %c0_15 = arith.constant 0 : index
    %c0_16 = arith.constant 0 : index
    %c0_17 = arith.constant 0 : index
    %16 = vector.load %arg9[%c0_15, %c0_16, %c0_17] : memref<1x1x128xf32, #tpu.memory_space<vmem>>, vector<1x1x128xf32>
    %17 = vector.shape_cast %16 : vector<1x1x128xf32> to vector<1x128xf32>
    %18 = vector.shape_cast %15 : vector<1x128xf32> to vector<1x1x128xf32>
    tpu.vector_store %arg9[%c0_15, %c0_16, %c0_17], %18 {strides = array<i32>} : memref<1x1x128xf32, #tpu.memory_space<vmem>>, vector<1x1x128xf32>,
    %19 = arith.truncf %15 : vector<1x128xf32> to vector<1x128xbf16>
    %c0_18 = arith.constant 0 : index
    %c0_19 = arith.constant 0 : index
    %20 = vector.load %arg7[%c0_18, %c0_19] : memref<128x10xbf16, #tpu.memory_space<vmem>>, vector<128x10xbf16>
    %cst_20 = arith.constant dense<0.000000e+00> : vector<1x10xf32>
    %21 = tpu.matmul %19, %20, %cst_20 {dimension_numbers = #tpu.dot_dimension_numbers<[1], [0], [0], [1], [0, 0, 1, 1], [], []>} : vector<1x128xbf16>, vector<128x10xbf16>, vector<1x10xf32> -> vector<1x10xf32>
    %c0_21 = arith.constant 0 : index
    %c0_22 = arith.constant 0 : index
    %22 = vector.load %arg8[%c0_21, %c0_22] : memref<1x10xf32, #tpu.memory_space<vmem>>, vector<1x10xf32>
    %23 = arith.addf %21, %22 : vector<1x10xf32>
    %c0_23 = arith.constant 0 : index
    %c0_24 = arith.constant 0 : index
    %c0_25 = arith.constant 0 : index
    %24 = vector.load %arg10[%c0_23, %c0_24, %c0_25] : memref<1x1x10xf32, #tpu.memory_space<vmem>>, vector<1x1x10xf32>
    %25 = vector.shape_cast %24 : vector<1x1x10xf32> to vector<1x10xf32>
    %26 = vector.shape_cast %23 : vector<1x10xf32> to vector<1x1x10xf32>
    tpu.vector_store %arg10[%c0_23, %c0_24, %c0_25], %26 {strides = array<i32>} : memref<1x1x10xf32, #tpu.memory_space<vmem>>, vector<1x1x10xf32>,
    return
  }
  func.func @transform_0(%arg0: i32) -> (i32, i32, i32) {
    %c0_i32 = arith.constant 0 : i32
    %c0_i32_0 = arith.constant 0 : i32
    %c0_i32_1 = arith.constant 0 : i32
    return %arg0, %c0_i32, %c0_i32_0 : i32, i32, i32
  }
  func.func @transform_1(%arg0: i32) -> (i32, i32) {
    %c0_i32 = arith.constant 0 : i32
    %c0_i32_0 = arith.constant 0 : i32
    %c0_i32_1 = arith.constant 0 : i32
    return %c0_i32, %c0_i32_0 : i32, i32
  }
  func.func @transform_2(%arg0: i32) -> (i32, i32) {
    %c0_i32 = arith.constant 0 : i32
    %c0_i32_0 = arith.constant 0 : i32
    %c0_i32_1 = arith.constant 0 : i32
    return %c0_i32, %c0_i32_0 : i32, i32
  }
  func.func @transform_3(%arg0: i32) -> (i32, i32) {
    %c0_i32 = arith.constant 0 : i32
    %c0_i32_0 = arith.constant 0 : i32
    %c0_i32_1 = arith.constant 0 : i32
    return %c0_i32, %c0_i32_0 : i32, i32
  }
  func.func @transform_4(%arg0: i32) -> (i32, i32) {
    %c0_i32 = arith.constant 0 : i32
    %c0_i32_0 = arith.constant 0 : i32
    %c0_i32_1 = arith.constant 0 : i32
    return %c0_i32, %c0_i32_0 : i32, i32
  }
  func.func @transform_5(%arg0: i32) -> (i32, i32) {
    %c0_i32 = arith.constant 0 : i32
    %c0_i32_0 = arith.constant 0 : i32
    %c0_i32_1 = arith.constant 0 : i32
    return %c0_i32, %c0_i32_0 : i32, i32
  }
  func.func @transform_6(%arg0: i32) -> (i32, i32) {
    %c0_i32 = arith.constant 0 : i32
    %c0_i32_0 = arith.constant 0 : i32
    %c0_i32_1 = arith.constant 0 : i32
    return %c0_i32, %c0_i32_0 : i32, i32
  }
  func.func @transform_7(%arg0: i32) -> (i32, i32) {
    %c0_i32 = arith.constant 0 : i32
    %c0_i32_0 = arith.constant 0 : i32
    %c0_i32_1 = arith.constant 0 : i32
    return %c0_i32, %c0_i32_0 : i32, i32
  }
  func.func @transform_8(%arg0: i32) -> (i32, i32, i32) {
    %c0_i32 = arith.constant 0 : i32
    %c0_i32_0 = arith.constant 0 : i32
    %c0_i32_1 = arith.constant 0 : i32
    return %arg0, %c0_i32, %c0_i32_0 : i32, i32, i32
  }
  func.func @transform_9(%arg0: i32) -> (i32, i32, i32) {
    %c0_i32 = arith.constant 0 : i32
    %c0_i32_0 = arith.constant 0 : i32
    %c0_i32_1 = arith.constant 0 : i32
    return %arg0, %c0_i32, %c0_i32_0 : i32, i32, i32
  }
}

</mosaic_0001>

<bundles_post_ra>
// kernel: tpu_custom_call.1
= control target key start
LH: loop header
LB: loop body
LE: loop exit
PB: predicated region body
PF: predicated region fallthrough
CT: control target
= control target key end

     0   :  { %s1829_s0 = inlined_call_operand.vmem [shape: bf16[2,196,32], index: 0, kind: input, shape index: {}]   ;;  %s1830_s1 = inlined_call_operand.vmem [shape: f32[1,196], index: 1, kind: input, shape index: {}]   ;;  %s1831_s2 = inlined_call_operand.vmem [shape: bf16[32,128], index: 2, kind: input, shape index: {}]   ;;  %s1832_s3 = inlined_call_operand.vmem [shape: f32[1,128], index: 3, kind: input, shape index: {}]   ;;  %s1833_s4 = inlined_call_operand.vmem [shape: bf16[128,128], index: 4, kind: input, shape index: {}]   ;;  %s1834_s5 = inlined_call_operand.vmem [shape: f32[1,128], index: 5, kind: input, shape index: {}]   ;;  %s1835_s6 = inlined_call_operand.vmem [shape: bf16[128,10], index: 6, kind: input, shape index: {}]   ;;  %s1836_s7 = inlined_call_operand.vmem [shape: f32[1,10], index: 7, kind: input, shape index: {}]   ;;  %s1837_s8 = inlined_call_operand.hbm [shape: f32[2,1,128], index: 8, kind: output, shape index: {0}]   ;;  %s1838_s9 = inlined_call_operand.hbm [shape: f32[2,1,10], index: 9, kind: output, shape index: {1}]  }
   0x1   :  { %1840 = sst [smem:[#allocation8_spill]] %s1829_s0 }
   0x2   :  { %1841 = sst [smem:[#allocation9_spill]] %s1830_s1 }
   0x3   :  { %15 = vsyncpa [#allocation3], 0 }
   0x4   :  { %17 = vsyncpa [#allocation3 + $0x1], 0 }
   0x5   :  { %18 = vsyncpa [#allocation5], 0 }
   0x6   :  { %20 = vsyncpa [#allocation5 + $0x1], 0  ;;  %s1478_s30 = smov 0   ;;  %s1480_s10 = smov 0  }
   0x7   :  { %s1482_s11 = smov 0   ;;  %s1484_s12 = smov 0  }
   0x8 LB: > { %s1499_s13 = sadd.s32 4294967295, %s1422_s12   ;;  %s1069_s14 = sadd.s32 4294967294, %s1422_s12   ;;  %s1422_s12 = sphi %s1484_s12, %s1850_s12   ;;  %s1418_s11 = sphi %s1482_s11, %s1849_s11   ;;  %s1414_s10 = sphi %s1480_s10, %s1848_s10   ;;  %s1410_s30 = sphi %s1478_s30, %s1847_s30  }
   0x9   : > { %s1503_s15 = sadd.s32 1, %s1422_s12   ;;  %s206_s16 = sadd.s32 1, %s1418_s11 }
   0xa   : > { %s203_s17 = ssub.s32 %s1422_s12, %s1503_s15  ;;  %p216_p0 = scmp.ne.s32.totalorder %s1418_s11, %s1414_s10 }
   0xb   : > { %p204_p1 = scmp.eq.s32.totalorder %s203_s17, 0  ;;  %p217_p2 = scmp.eq.s32.totalorder %s1499_s13, 1 }
   0xc   : > { %p222_p3 = scmp.ne.s32.totalorder %s1414_s10, %s1410_s30  ;;  %p223_p4 = scmp.eq.s32.totalorder %s1069_s14, 1 }
   0xd   : > { %s1514_s18 = scalar_select %p204_p1, %s1418_s11, %s206_s16  }
   0xe   : > { %p1516_p5 = por %p217_p2, %p216_p0  ;;  %p1520_p6 = por %p223_p4, %p222_p3 }
   0xf   : > { %p1072_p7 = scmp.ge.s32.totalorder %s1422_s12, 1  ;;  %p296_p8 = scmp.lt.s32.totalorder %s1422_s12, 3 }
  0x11   : > { %p297_p9 = pnand %p1072_p7, %p296_p8 }
  0x12   : > { %p335_p10 = scmp.lt.s32.totalorder (!%p297_p9), %s1499_s13, 1  ;;  %s1844_s0 = sld [smem:[#allocation8_spill]] (!%p297_p9) }
  0x13   : > { %300 = sbr.rel (%p297_p9) target bundleno = 944 (0x3b0), region = 52  ;;  %s1845_s1 = sld [smem:[#allocation9_spill]] (!%p297_p9) }
  0x14   : > { %s1753_s14 = sand.u32 (!%p297_p9), 1, %s1414_s10   ;;  %s1839_s22 = sshll.u32 (!%p297_p9), %s1499_s13, 4 }
  0x15   : > { %s328_s21 = scalar_lea.vmem (!%p297_p9), [#allocation2], %s1753_s14  ;;  %s957_s27 = scalar_lea.sflag (!%p297_p9), [#allocation3], %s1753_s14 }
  0x16   : > { %s973_s23 = sshll.u32 (!%p297_p9), %s328_s21, 4  ;;  %s974_s23 = int_to_ptr.vmem [resolvable:$true] %s973_s23 }
  0x17   : > { %s1332_s28 = scalar_lea.vmem (!%p297_p9), %s974_s23, 16 }
  0x18   : > { %v1301_v0 = vld [vmem:[%s1831_s2 + $0x8] sm:$0xff]   ;;  %v1424_v1 = vmov 0.0   ;;  %v1302_v2 = vld [vmem:[%s1831_s2] sm:$0xff]   ;;  %vm1425_vm0 = vmmov 0   ;;  %s336_s25 = scalar_select %p335_p10, %s1499_s13, 1  ;;  %vm452_vm1 = vcmask 261120   ;;  %v655_v16 = vlaneseq }
  0x19   : > { %1158 = vmatprep.subr.bf16.mxu0 %v1424_v1  ;;  %671 = vmatprep.subr.mxu1 %v1424_v1  ;;  %v653_v19 = vld [vmem:[%s1845_s1] sm:$0x3]  ;;  %vm664_vm2 = vcmask 556032   ;;  %vm667_vm3 = vcmask 1043456   ;;  %p1333_p11 = scmp.ne.s32.totalorder %s974_s23, %s1332_s28 }
  0x1a   : > { %1159 = vmatpush3.bf16.msra.mxu0 %v1301_v0  ;;  %1162 = vmatprep.mubr.msk.bf16.mxu0 %vm1425_vm0, %v1424_v1  ;;  %s1254_s26 = smul.u32 100, %s336_s25  ;;  %v656_v17 = vshrl.u32 %v655_v16, 7  ;;  %v1617_v53 = vld [vmem:[%s1832_s3] ss:$0 sm:$0xff] }
  0x1b   : > { %1160 = vmatprep.subr.bf16.mxu0 %v1424_v1  ;;  %p1334_p12 = pnand %p1333_p11, %p1516_p5 }
  0x1c   : > { %s1543_s29 = scalar_lea.vmem %s1844_s0, %s1254_s26  ;;  %v661_v18 = vsub.s32 1, %v656_v17  ;;  %v657_v20 = vsub.s32 0, %v656_v17  ;;  %s971_s26 = scalar_lea.hbm %s1837_s8, %s1839_s22 }
  0x1d   : > { %v1303_v3 = vld [vmem:[%s1543_s29] sm:$0xff]   ;;  %v1304_v4 = vld [vmem:[%s1543_s29 + $0x8] sm:$0xff]   ;;  %v1305_v5 = vld [vmem:[%s1543_s29 + $0x10] sm:$0xff]   ;;  %p1335_p13 = pneg %p1334_p12 }
  0x1e   : > { %1161 = vmatpush3.bf16.msra.mxu0 %v1302_v2  ;;  %v1306_v6 = vld [vmem:[%s1543_s29 + $0x18] sm:$0xff]   ;;  %v1307_v7 = vld [vmem:[%s1543_s29 + $0x20] sm:$0xff]   ;;  %v1308_v8 = vld [vmem:[%s1543_s29 + $0x28] sm:$0xff]   ;;  %v662_v21 = vrot.slane %v653_v19, %v661_v18  ;;  %v1600_v22 = vrot.slane %v653_v19, %v657_v20 }
  0x1f   : > { %1234 = vmatprep.subr.bf16.mxu0 %v1424_v1  ;;  %v1309_v9 = vld [vmem:[%s1543_s29 + $0x30] sm:$0xff]   ;;  %v1310_v10 = vld [vmem:[%s1543_s29 + $0x38] sm:$0xff]   ;;  %v1311_v11 = vld [vmem:[%s1543_s29 + $0x40] sm:$0xff]  }
  0x20   : > { %v1312_v12 = vld [vmem:[%s1543_s29 + $0x48] sm:$0xff]   ;;  %v1313_v13 = vld [vmem:[%s1543_s29 + $0x50] sm:$0xff]   ;;  %v1314_v14 = vld [vmem:[%s1543_s29 + $0x58] sm:$0xff]   ;;  %1104 = vmatprep.mubr.msk.f32.mxu1 %vm664_vm2, %v662_v21 }
  0x21   : > { %1163 = vmatmul.mubr.msk.bf16.vlgmr.msra.gmra.mxu0 %vm452_vm1, %v1303_v3  ;;  %v1315_v15 = vld [vmem:[%s1543_s29 + $0x60] ss:$0 sps:$4 sm:$0x33]   ;;  %s1426_s29 = smov [#allocation2]  }
  0x22   : > { %1166 = vmatprep.mubr.msk.bf16.mxu0 %vm1425_vm0, %v1424_v1  ;;  %s1336_s16 = sshll.u32 %s1426_s29, 4  ;;  %s1337_s16 = int_to_ptr.vmem [resolvable:$false] %s1336_s16 }
  0x23   : > { %s1338_s17 = scalar_lea.vmem %s1337_s16, 32  ;;  %p1339_p0 = scmp.lt.s32.totalorder %s974_s23, %s1337_s16 }
  0x24   : > { %p1340_p1 = scmp.lt.s32.totalorder %s1338_s17, %s1332_s28 }
  0x26   : > { %p1341_p2 = por %p1340_p1, %p1339_p0 }
  0x28   : > { %p1342_p3 = pnand %p1341_p2, %p1335_p13 }
  0x29   : > { %1167 = vmatmul.mubr.msk.bf16.gmra.mxu0 %vm452_vm1, %v1304_v4 }
  0x2a   : > { %1170 = vmatprep.mubr.msk.bf16.mxu0 %vm1425_vm0, %v1424_v1 }
  0x31   : > { %1171 = vmatmul.mubr.msk.bf16.gmra.mxu0 %vm452_vm1, %v1305_v5 }
  0x32   : > { %1174 = vmatprep.mubr.msk.bf16.mxu0 %vm1425_vm0, %v1424_v1 }
  0x39   : > { %1175 = vmatmul.mubr.msk.bf16.gmra.mxu0 %vm452_vm1, %v1306_v6 }
  0x3a   : > { %1178 = vmatprep.mubr.msk.bf16.mxu0 %vm1425_vm0, %v1424_v1 }
  0x41   : > { %1179 = vmatmul.mubr.msk.bf16.gmra.mxu0 %vm452_vm1, %v1307_v7 }
  0x42   : > { %1182 = vmatprep.mubr.msk.bf16.mxu0 %vm1425_vm0, %v1424_v1 }
  0x49   : > { %1183 = vmatmul.mubr.msk.bf16.gmra.mxu0 %vm452_vm1, %v1308_v8 }
  0x4a   : > { %1186 = vmatprep.mubr.msk.bf16.mxu0 %vm1425_vm0, %v1424_v1 }
  0x51   : > { %1187 = vmatmul.mubr.msk.bf16.gmra.mxu0 %vm452_vm1, %v1309_v9 }
  0x52   : > { %1190 = vmatprep.mubr.msk.bf16.mxu0 %vm1425_vm0, %v1424_v1 }
  0x59   : > { %1191 = vmatmul.mubr.msk.bf16.gmra.mxu0 %vm452_vm1, %v1310_v10 }
  0x5a   : > { %1194 = vmatprep.mubr.msk.bf16.mxu0 %vm1425_vm0, %v1424_v1 }
  0x61   : > { %1195 = vmatmul.mubr.msk.bf16.gmra.mxu0 %vm452_vm1, %v1311_v11 }
  0x62   : > { %1198 = vmatprep.mubr.msk.bf16.mxu0 %vm1425_vm0, %v1424_v1 }
  0x69   : > { %1199 = vmatmul.mubr.msk.bf16.gmra.mxu0 %vm452_vm1, %v1312_v12 }
  0x6a   : > { %1202 = vmatprep.mubr.msk.bf16.mxu0 %vm1425_vm0, %v1424_v1 }
  0x71   : > { %1203 = vmatmul.mubr.msk.bf16.gmra.mxu0 %vm452_vm1, %v1313_v13 }
  0x72   : > { %1206 = vmatprep.mubr.msk.bf16.mxu0 %vm1425_vm0, %v1424_v1 }
  0x79   : > { %1207 = vmatmul.mubr.msk.bf16.gmra.mxu0 %vm452_vm1, %v1314_v14 }
  0x7a   : > { %1210 = vmatprep.mubr.msk.bf16.mxu0 %vm1425_vm0, %v1424_v1 }
  0x81   : > { %1211 = vmatmul.mubr.msk.bf16.gmra.mxu0 %vm452_vm1, %v1315_v15 }
  0x82   : > { %1250 = vmatprep.mubr.msk.bf16.mxu0 %vm1425_vm0, %v1424_v1 }
  0xe1   : > { %v1602_v23 = vpop.f32.mrf.mxu0 }
  0xe3   : > { %v1164_v24 = vpop.f32.mrf.mxu0 }
  0xe5   : > { %v1604_v25 = vpop.f32.mrf.mxu0 }
  0xe7   : > { %v1165_v26 = vpop.f32.mrf.mxu0 }
  0xe9   : > { %v1606_v27 = vpop.f32.mrf.mxu0 }
  0xeb   : > { %v1168_v28 = vpop.f32.mrf.mxu0 }
  0xed   : > { %v1608_v29 = vpop.f32.mrf.mxu0 }
  0xef   : > { %v1169_v30 = vpop.f32.mrf.mxu0 }
  0xf0   : > { %v538_v30 = vadd.f32 %v1617_v53, %v1608_v29  ;;  %v527_v29 = vadd.f32 %v1617_v53, %v1602_v23 }
  0xf1   : > { %v1610_v31 = vpop.f32.mrf.mxu0 }
  0xf2   : > { %v543_v24 = vadd.f32 %v1617_v53, %v1610_v31  ;;  %v530_v31 = vadd.f32 %v1617_v53, %v1604_v25 }
  0xf3   : > { %v1172_v32 = vpop.f32.mrf.mxu0 }
  0xf5   : > { %v1612_v33 = vpop.f32.mrf.mxu0 }
  0xf6   : > { %v546_v19 = vadd.f32 %v1617_v53, %v1612_v33  ;;  %v535_v33 = vadd.f32 %v1617_v53, %v1606_v27  ;;  %v629_v27 = vmax.f32 %v530_v31, 0.0 }
  0xf7   : > { %v1173_v34 = vpop.f32.mrf.mxu0 }
  0xf8   : > { %v633_v32 = vmax.f32 %v546_v19, 0.0  ;;  %v758_v19 = vld [vmem:[%s1834_s5] sm:$0x1] }
  0xf9   : > { %v550_v35 = vpop.f32.mrf.mxu0 }
  0xfa   : > { %v551_v16 = vadd.f32 %v1617_v53, %v550_v35  ;;  %v632_v35 = vmax.f32 %v543_v24, 0.0 }
  0xfb   : > { %v1176_v36 = vpop.f32.mrf.mxu0 }
  0xfc   : > { %v634_v26 = vmax.f32 %v551_v16, 0.0 }
  0xfd   : > { %v553_v37 = vpop.f32.mrf.mxu0 }
  0xfe   : > { %v554_v13 = vadd.f32 %v1617_v53, %v553_v37  ;;  %v631_v37 = vmax.f32 %v538_v30, 0.0 }
  0xff   : > { %v1177_v38 = vpop.f32.mrf.mxu0 }
 0x100   : > { %v635_v20 = vmax.f32 %v554_v13, 0.0  ;;  %v1329_v13 = vld [vmem:[%s1835_s6 + $0x10] sm:$0xff]  }
 0x101   : > { %v558_v39 = vpop.f32.mrf.mxu0 }
 0x102   : > { %v559_v10 = vadd.f32 %v1617_v53, %v558_v39  ;;  %v630_v39 = vmax.f32 %v535_v33, 0.0 }
 0x103   : > { %v1180_v40 = vpop.f32.mrf.mxu0 }
 0x104   : > { %v636_v17 = vmax.f32 %v559_v10, 0.0  ;;  %v1326_v10 = vld [vmem:[%s1835_s6 + $0x28] sm:$0xff]  }
 0x105   : > { %v561_v41 = vpop.f32.mrf.mxu0 }
 0x106   : > { %v562_v7 = vadd.f32 %v1617_v53, %v561_v41 }
 0x107   : > { %v1181_v42 = vpop.f32.mrf.mxu0 }
 0x108   : > { %v637_v14 = vmax.f32 %v562_v7, 0.0  ;;  %v628_v42 = vmax.f32 %v527_v29, 0.0  ;;  %v1323_v7 = vld [vmem:[%s1833_s4] sm:$0xff]  }
 0x109   : > { %v566_v43 = vpop.f32.mrf.mxu0 }
 0x10a   : > { %v567_v4 = vadd.f32 %v1617_v53, %v566_v43 }
 0x10b   : > { %v1184_v44 = vpop.f32.mrf.mxu0 }
 0x10c   : > { %v638_v11 = vmax.f32 %v567_v4, 0.0  ;;  %v1320_v4 = vld [vmem:[%s1833_s4 + $0x18] sm:$0xff]  }
 0x10d   : > { %v569_v45 = vpop.f32.mrf.mxu0 }
 0x10e   : > { %v570_v0 = vadd.f32 %v1617_v53, %v569_v45 }
 0x10f   : > { %v1185_v46 = vpop.f32.mrf.mxu0 }
 0x110   : > { %v639_v8 = vmax.f32 %v570_v0, 0.0 }
 0x111   : > { %v574_v47 = vpop.f32.mrf.mxu0 }
 0x112   : > { %v575_v61 = vadd.f32 %v1617_v53, %v574_v47 }
 0x113   : > { %v1188_v48 = vpop.f32.mrf.mxu0 }
 0x114   : > { %v640_v5 = vmax.f32 %v575_v61, 0.0 }
 0x115   : > { %v577_v49 = vpop.f32.mrf.mxu0 }
 0x116   : > { %v578_v58 = vadd.f32 %v1617_v53, %v577_v49 }
 0x117   : > { %v1189_v50 = vpop.f32.mrf.mxu0 }
 0x118   : > { %v641_v2 = vmax.f32 %v578_v58, 0.0 }
 0x119   : > { %v582_v51 = vpop.f32.mrf.mxu0 }
 0x11a   : > { %v583_v55 = vadd.f32 %v1617_v53, %v582_v51 }
 0x11b   : > { %v1192_v52 = vpop.f32.mrf.mxu0 }
 0x11c   : > { %v642_v62 = vmax.f32 %v583_v55, 0.0 }
 0x11d   : > { %v585_v54 = vpop.f32.mrf.mxu0 }
 0x11e   : > { %v586_v56 = vadd.f32 %v1617_v53, %v585_v54 }
 0x11f   : > { %v1193_v57 = vpop.f32.mrf.mxu0 }
 0x120   : > { %v643_v59 = vmax.f32 %v586_v56, 0.0 }
 0x121   : > { %v1622_v60 = vpop.f32.mrf.mxu0 }
 0x122   : > { %672 = vmatpush1.msra.mxu1 %v643_v59 }
 0x123   : > { %v1196_v63 = vpop.f32.mrf.mxu0  ;;  %673 = vmatprep.subr.mxu1 %v1424_v1 }
 0x124   : > { %674 = vmatpush1.msra.mxu1 %v642_v62  ;;  %v591_v62 = vadd.f32 %v1617_v53, %v1622_v60  ;;  %v1318_v60 = vld [vmem:[%s1833_s4 + $0x28] sm:$0xff]  }
 0x125   : > { %v1627_v3 = vpop.f32.mrf.mxu0  ;;  %675 = vmatprep.subr.mxu1 %v1424_v1 }
 0x126   : > { %676 = vmatpush1.msra.mxu1 %v641_v2  ;;  %v594_v59 = vadd.f32 %v1617_v53, %v1627_v3  ;;  %v644_v2 = vmax.f32 %v591_v62, 0.0  ;;  %v1316_v3 = vld [vmem:[%s1833_s4 + $0x38] sm:$0xff]  }
 0x127   : > { %v1197_v6 = vpop.f32.mrf.mxu0  ;;  %677 = vmatprep.subr.mxu1 %v1424_v1 }
 0x128   : > { %678 = vmatpush1.msra.mxu1 %v640_v5  ;;  %v645_v0 = vmax.f32 %v594_v59, 0.0  ;;  %v1321_v5 = vld [vmem:[%s1833_s4 + $0x10] sm:$0xff]   ;;  %v1322_v6 = vld [vmem:[%s1833_s4 + $0x8] sm:$0xff]  }
 0x129   : > { %v1633_v9 = vpop.f32.mrf.mxu0  ;;  %679 = vmatprep.subr.mxu1 %v1424_v1 }
 0x12a   : > { %680 = vmatpush1.msra.mxu1 %v639_v8  ;;  %v599_v57 = vadd.f32 %v1617_v53, %v1633_v9  ;;  %v1324_v8 = vld [vmem:[%s1835_s6 + $0x38] sm:$0xff]   ;;  %v1325_v9 = vld [vmem:[%s1835_s6 + $0x30] sm:$0xff]  }
 0x12b   : > { %v1200_v12 = vpop.f32.mrf.mxu0  ;;  %681 = vmatprep.subr.mxu1 %v1424_v1  ;;  %1235 = vmatpush3.bf16.msra.mxu0 %v1324_v8 }
 0x12c   : > { %682 = vmatpush1.msra.mxu1 %v638_v11  ;;  %v646_v63 = vmax.f32 %v599_v57, 0.0  ;;  %1236 = vmatprep.subr.bf16.mxu0 %v1424_v1  ;;  %v1327_v11 = vld [vmem:[%s1835_s6 + $0x20] sm:$0xff]   ;;  %v1328_v12 = vld [vmem:[%s1835_s6 + $0x18] sm:$0xff]  }
 0x12d   : > { %v1639_v15 = vpop.f32.mrf.mxu0  ;;  %683 = vmatprep.subr.mxu1 %v1424_v1 }
 0x12e   : > { %684 = vmatpush1.msra.mxu1 %v637_v14  ;;  %v602_v55 = vadd.f32 %v1617_v53, %v1639_v15  ;;  %v1330_v14 = vld [vmem:[%s1835_s6 + $0x8] sm:$0xff]   ;;  %v1331_v15 = vld [vmem:[%s1835_s6] sm:$0xff]  }
 0x12f   : > { %v1201_v18 = vpop.f32.mrf.mxu0  ;;  %685 = vmatprep.subr.mxu1 %v1424_v1  ;;  %1237 = vmatpush3.bf16.msra.mxu0 %v1325_v9 }
 0x130   : > { %686 = vmatpush1.msra.mxu1 %v636_v17  ;;  %v647_v61 = vmax.f32 %v602_v55, 0.0  ;;  %1238 = vmatprep.subr.bf16.mxu0 %v1424_v1 }
 0x131   : > { %v606_v21 = vpop.f32.mrf.mxu0  ;;  %687 = vmatprep.subr.mxu1 %v1424_v1 }
 0x132   : > { %688 = vmatpush1.msra.mxu1 %v635_v20  ;;  %v607_v52 = vadd.f32 %v1617_v53, %v606_v21 }
 0x133   : > { %v1204_v28 = vpop.f32.mrf.mxu0  ;;  %689 = vmatprep.subr.mxu1 %v1424_v1  ;;  %1239 = vmatpush3.bf16.msra.mxu0 %v1326_v10 }
 0x134   : > { %690 = vmatpush1.msra.mxu1 %v634_v26  ;;  %v648_v58 = vmax.f32 %v607_v52, 0.0  ;;  %1240 = vmatprep.subr.bf16.mxu0 %v1424_v1 }
 0x135   : > { %v609_v34 = vpop.f32.mrf.mxu0  ;;  %691 = vmatprep.subr.mxu1 %v1424_v1 }
 0x136   : > { %692 = vmatpush1.msra.mxu1 %v633_v32  ;;  %v610_v49 = vadd.f32 %v1617_v53, %v609_v34 }
 0x137   : > { %v1205_v36 = vpop.f32.mrf.mxu0  ;;  %693 = vmatprep.subr.mxu1 %v1424_v1  ;;  %1241 = vmatpush3.bf16.msra.mxu0 %v1327_v11 }
 0x138   : > { %694 = vmatpush1.msra.mxu1 %v632_v35  ;;  %v649_v56 = vmax.f32 %v610_v49, 0.0  ;;  %1242 = vmatprep.subr.bf16.mxu0 %v1424_v1 }
 0x139   : > { %v614_v38 = vpop.f32.mrf.mxu0  ;;  %695 = vmatprep.subr.mxu1 %v1424_v1 }
 0x13a   : > { %696 = vmatpush1.msra.mxu1 %v631_v37  ;;  %v615_v46 = vadd.f32 %v1617_v53, %v614_v38 }
 0x13b   : > { %v1208_v40 = vpop.f32.mrf.mxu0  ;;  %697 = vmatprep.subr.mxu1 %v1424_v1  ;;  %1243 = vmatpush3.bf16.msra.mxu0 %v1328_v12 }
 0x13c   : > { %698 = vmatpush1.msra.mxu1 %v630_v39  ;;  %v650_v54 = vmax.f32 %v615_v46, 0.0  ;;  %1244 = vmatprep.subr.bf16.mxu0 %v1424_v1 }
 0x13d   : > { %v617_v41 = vpop.f32.mrf.mxu0  ;;  %699 = vmatprep.subr.mxu1 %v1424_v1 }
 0x13e   : > { %700 = vmatpush1.msra.mxu1 %v629_v27  ;;  %v618_v23 = vadd.f32 %v1617_v53, %v617_v41 }
 0x13f   : > { %v1209_v25 = vpop.f32.mrf.mxu0  ;;  %701 = vmatprep.subr.mxu1 %v1424_v1  ;;  %1245 = vmatpush3.bf16.msra.mxu0 %v1329_v13 }
 0x140   : > { %702 = vmatpush1.msra.mxu1 %v628_v42  ;;  %v651_v50 = vmax.f32 %v618_v23, 0.0  ;;  %1246 = vmatprep.subr.bf16.mxu0 %v1424_v1 }
 0x141   : > { %v622_v43 = vpop.f32.mrf.mxu0  ;;  %717 = vmatprep.subr.mxu1 %v1424_v1 }
 0x142   : > { %v623_v44 = vadd.f32 %v1617_v53, %v622_v43  ;;  %v1317_v53 = vld [vmem:[%s1833_s4 + $0x30] sm:$0xff]  }
 0x143   : > { %v1212_v45 = vpop.f32.mrf.mxu0  ;;  %1247 = vmatpush3.bf16.msra.mxu0 %v1330_v14 }
 0x144   : > { %v652_v47 = vmax.f32 %v623_v44, 0.0  ;;  %1248 = vmatprep.subr.bf16.mxu0 %v1424_v1 }
 0x145   : > { %v625_v48 = vpop.f32.mrf.mxu0 }
 0x146   : > { %1103 = vmatpush2.msk.msra.mxu1 %vm667_vm3, %v652_v47 }
 0x147   : > { %v1213_v51 = vpop.f32.mrf.mxu0  ;;  %719 = vmatprep.subr.mxu1 %v1424_v1  ;;  %1249 = vmatpush3.bf16.msra.mxu0 %v1331_v15 }
 0x148   : > { %720 = vmatpush2.msra.mxu1 %v651_v50 }
 0x149   : > { %721 = vmatprep.subr.mxu1 %v1424_v1 }
 0x14a   : > { %722 = vmatpush2.msra.mxu1 %v650_v54 }
 0x14b   : > { %723 = vmatprep.subr.mxu1 %v1424_v1 }
 0x14c   : > { %724 = vmatpush2.msra.mxu1 %v649_v56 }
 0x14d   : > { %725 = vmatprep.subr.mxu1 %v1424_v1 }
 0x14e   : > { %726 = vmatpush2.msra.mxu1 %v648_v58 }
 0x14f   : > { %727 = vmatprep.subr.mxu1 %v1424_v1 }
 0x150   : > { %728 = vmatpush2.msra.mxu1 %v647_v61 }
 0x151   : > { %729 = vmatprep.subr.mxu1 %v1424_v1 }
 0x152   : > { %730 = vmatpush2.msra.mxu1 %v646_v63 }
 0x153   : > { %731 = vmatprep.subr.mxu1 %v1424_v1 }
 0x154   : > { %732 = vmatpush2.msra.mxu1 %v645_v0 }
 0x155   : > { %733 = vmatprep.subr.mxu1 %v1424_v1 }
 0x156   : > { %734 = vmatpush2.msra.mxu1 %v644_v2 }
 0x157   : > { %736 = vmatmul.mubr.f32.vlgmr.msra.gmra.mxu1 %v1600_v22  ;;  %1214 = vmatprep.subr.bf16.mxu1 %v1424_v1  ;;  %v1319_v22 = vld [vmem:[%s1833_s4 + $0x20] sm:$0xff]  }
 0x158   : > { %1215 = vmatpush3.bf16.msra.mxu1 %v1316_v3  ;;  %1230 = vmatprep.mubr.msk.bf16.mxu1 %vm1425_vm0, %v1424_v1 }
 0x159   : > { %1216 = vmatprep.subr.bf16.mxu1 %v1424_v1 }
 0x15c   : > { %1217 = vmatpush3.bf16.msra.mxu1 %v1317_v53 }
 0x15d   : > { %1218 = vmatprep.subr.bf16.mxu1 %v1424_v1 }
 0x160   : > { %1219 = vmatpush3.bf16.msra.mxu1 %v1318_v60 }
 0x161   : > { %1220 = vmatprep.subr.bf16.mxu1 %v1424_v1 }
 0x164   : > { %1221 = vmatpush3.bf16.msra.mxu1 %v1319_v22 }
 0x165   : > { %1222 = vmatprep.subr.bf16.mxu1 %v1424_v1 }
 0x168   : > { %1223 = vmatpush3.bf16.msra.mxu1 %v1320_v4 }
 0x169   : > { %1224 = vmatprep.subr.bf16.mxu1 %v1424_v1 }
 0x16c   : > { %1225 = vmatpush3.bf16.msra.mxu1 %v1321_v5 }
 0x16d   : > { %1226 = vmatprep.subr.bf16.mxu1 %v1424_v1 }
 0x170   : > { %1227 = vmatpush3.bf16.msra.mxu1 %v1322_v6 }
 0x171   : > { %1228 = vmatprep.subr.bf16.mxu1 %v1424_v1 }
 0x174   : > { %1229 = vmatpush3.bf16.msra.mxu1 %v1323_v7 }
 0x217   : > { %v737_v16 = vpop.f32.mrf.mxu1 }
 0x218   : > { %v741_v17 = vpack.c.bf16 %v737_v16, %v737_v16 }
 0x219   : > { %v739_v18 = vpop.f32.mrf.mxu1 }
 0x21a   : > { %1231 = vmatmul.mubr.bf16.vlgmr.msra.gmra.mxu1 %v741_v17 }
 0x2da   : > { %v841_v20 = vpop.f32.mrf.mxu1 }
 0x2db   : > { %v842_v21 = vadd.f32 %v841_v20, %v758_v19 }
 0x2dc   : > { %v1232_v24 = vpop.f32.mrf.mxu1 }
 0x2dd   : > { %847 = vst [vmem:[%s328_s21] sm:$0x1] %v842_v21  ;;  %v848_v1 = vpack.c.bf16 %v842_v21, %v842_v21 }
 0x2de   : > { %v844_v26 = vpop.f32.mrf.mxu1 }
 0x2df   : > { %1251 = vmatmul.mubr.bf16.vlgmr.msra.gmra.mxu0 %v848_v1 }
 0x2e0   : > { %v1233_v28 = vpop.f32.mrf.mxu1 }
 0x2e1   : > { %1345 = shalt.err (!%p1342_p3)
}
 0x2e2   : > { %s1346_s21 = scalar_lea.hbm %s971_s26, 16  ;;  %s1350_s22 = scalar_lea.hbm %s1837_s8, 32 }
 0x2e3   : > { %p1347_p4 = scmp.ne.s32.totalorder %s971_s26, %s1346_s21  ;;  %p1351_p9 = scmp.lt.s32.totalorder %s971_s26, %s1837_s8 }
 0x2e4   : > { %p1352_p10 = scmp.lt.s32.totalorder %s1350_s22, %s1346_s21 }
 0x2e5   : > { %p1348_p7 = pnand %p1347_p4, %p1516_p5 }
 0x2e6   : > { %p1353_p11 = por %p1352_p10, %p1351_p9 }
 0x2e7   : > { %p1349_p8 = pneg %p1348_p7 }
 0x2e9   : > { %p1354_p12 = pnand %p1353_p11, %p1349_p8 }
 0x2eb   : > { %1357 = shalt.err (!%p1354_p12)
}
 0x2ec   : > { %1255 = dma.vmem_to_hbm [thread:$0]  (%p1516_p5), %s974_s23, 16, %s971_s26, %s957_s27   ;;  %v865_v30 = vld [vmem:[%s1836_s7] sm:$0x1]  ;;  %vm954_vm4 = vcmask 73728  }
 0x2ed   : > { %s334_s16 = scalar_lea.vmem [#allocation4], %s1753_s14  ;;  %s1846_s0 = sshll.u32 %s1499_s13, 4 }
 0x2ee   : > { %s986_s17 = sshll.u32 %s334_s16, 4  ;;  %s1787_s21 = scalar_lea.hbm %s1838_s9, %s1846_s0  ;;  %s1789_s17 = int_to_ptr.vmem [resolvable:$true] %s986_s17 }
 0x2ef   : > { %s961_s23 = scalar_lea.sflag [#allocation5], %s1753_s14  ;;  %s1358_s26 = scalar_lea.vmem %s1789_s17, 16 }
 0x2f0   : > { %p1359_p13 = scmp.ne.s32.totalorder %s1789_s17, %s1358_s26  ;;  %s1427_s13 = smov [#allocation4]  }
 0x2f1   : > { %s1362_s27 = sshll.u32 %s1427_s13, 4  ;;  %s1363_s27 = int_to_ptr.vmem [resolvable:$false] %s1362_s27 }
 0x2f2   : > { %p1360_p0 = pnand %p1359_p13, %p1516_p5  ;;  %s1364_s24 = scalar_lea.vmem %s1363_s27, 32 }
 0x2f3   : > { %p1365_p2 = scmp.lt.s32.totalorder %s1789_s17, %s1363_s27  ;;  %p1366_p3 = scmp.lt.s32.totalorder %s1364_s24, %s1358_s26 }
 0x2f4   : > { %p1361_p1 = pneg %p1360_p0 }
 0x2f5   : > { %p1367_p4 = por %p1366_p3, %p1365_p2 }
 0x2f7   : > { %p1368_p7 = pnand %p1367_p4, %p1361_p1 }
 0x39f   : > { %v948_v32 = vpop.f32.mrf.mxu0 }
 0x3a0   : > { %v949_v34 = vadd.f32 %v948_v32, %v865_v30 }
 0x3a1   : > { %v1252_v33 = vpop.f32.mrf.mxu0 }
 0x3a2   : > { %955 = vst.msk [vmem:[%s334_s16] sm:$0x1] %vm954_vm4, %v949_v34 }
 0x3a3   : > { %v951_v35 = vpop.f32.mrf.mxu0 }
 0x3a4   : > { %1371 = shalt.err (!%p1368_p7)
}
 0x3a5   : > { %s1372_s25 = scalar_lea.hbm %s1787_s21, 16  ;;  %s1376_s29 = scalar_lea.hbm %s1838_s9, 32 }
 0x3a6   : > { %p1373_p8 = scmp.ne.s32.totalorder %s1787_s21, %s1372_s25  ;;  %p1377_p11 = scmp.lt.s32.totalorder %s1787_s21, %s1838_s9 }
 0x3a7   : > { %p1378_p12 = scmp.lt.s32.totalorder %s1376_s29, %s1372_s25 }
 0x3a8   : > { %p1374_p9 = pnand %p1373_p8, %p1516_p5 }
 0x3a9   : > { %p1379_p13 = por %p1378_p12, %p1377_p11 }
 0x3aa   : > { %p1375_p10 = pneg %p1374_p9 }
 0x3ac   : > { %p1380_p0 = pnand %p1379_p13, %p1375_p10 }
 0x3ae   : > { %1383 = shalt.err (!%p1380_p0)
}
 0x3af   : > { %1256 = dma.vmem_to_hbm [thread:$0]  (%p1516_p5), %s1789_s17, 16, %s1787_s21, %s961_s23   ;;  %v1253_v36 = vpop.f32.mrf.mxu0 }
 0x3b0 PF: > { %p1266_p1 = scmp.ge.s32.totalorder %s1422_s12, 2  ;;  %s998_s1 = sand.u32 1, %s1410_s30  }
 0x3b1   : > { %s999_s22 = scalar_lea.sflag [#allocation3], %s998_s1 }
 0x3b2   : > { %p1260_p2 = pnand %p1266_p1, %p1520_p6 }
 0x3b4   : > { %p1261_p3 = pneg %p1260_p2 }
 0x3b6   : > { %1401 = dma.done.wait (%p1261_p3), %s999_s22, 16  }
 0x3b7   : > { %1403 = vsyncadd (%p1261_p3), %s999_s22, 4294967280  ;;  %s1007_s26 = scalar_lea.sflag [#allocation5], %s998_s1 }
 0x3b8   : > { %1405 = dma.done.wait (%p1261_p3), %s1007_s26, 16  }
 0x3b9   : > { %1407 = vsyncadd (%p1261_p3), %s1007_s26, 4294967280  ;;  %p23_p5 = scmp.ge.s32.totalorder %s1503_s15, 4   ;;  %s1847_s30 = smov %s1414_s10 }
 0x3ba   : > { %s1848_s10 = smov %s1418_s11  ;;  %s1849_s11 = smov %s1514_s18 }
 0x3bb   : > { %s1850_s12 = smov %s1503_s15  ;;  %25 = sbr.rel (!%p23_p5) target bundleno = 8 (0x8), region = 104 }
 0x3c0   :  { %1011 = vsyncpa [#allocation3], 1 }
 0x3c1   :  { %1013 = vsyncpa [#allocation3 + $0x1], 1 }
 0x3c2   :  { %1014 = vsyncpa [#allocation5], 1 }
 0x3c3   :  { %1016 = vsyncpa [#allocation5 + $0x1], 1 }

</bundles_post_ra>
